<compile_context>
chip_gen: v6e
topology: v6e:2x2x1
jax: 0.10.0
libtpu: 0.0.40
codegen_flags: <defaults>
</compile_context>

<pallas_src>
import functools
import numpy as np
import jax
import jax.numpy as jnp
from jax.experimental import pallas as pl
from jax.experimental.pallas import tpu as pltpu


def _rope_fold_matrix(num_heads, depth):
    """Constant (C, C) matrix R such that rope(x) == x @ R (head-index angles)."""
    d_half = depth // 2
    inv_freq = 1.0 / (10000.0 ** (np.arange(0, depth, 2, dtype=np.float64) / depth))
    angles = np.outer(np.arange(num_heads, dtype=np.float64), inv_freq)   # (H, D/2)
    C = num_heads * depth
    R = np.zeros((C, C), dtype=np.float64)
    for h in range(num_heads):
        base = h * depth
        for i in range(d_half):
            c = np.cos(angles[h, i])
            s = np.sin(angles[h, i])
            # out[2i]   = x[2i]*c - x[2i+1]*s
            # out[2i+1] = x[2i]*s + x[2i+1]*c
            R[base + 2 * i,     base + 2 * i]     = c
            R[base + 2 * i + 1, base + 2 * i]     = -s
            R[base + 2 * i,     base + 2 * i + 1] = s
            R[base + 2 * i + 1, base + 2 * i + 1] = c
    return R.astype(np.float32)


def encoder_block_pallas(x, params, *, num_heads, q_tile=512):
    B, T, C = x.shape
    H = num_heads
    D = C // H
    d_ff = params["w1"].shape[1]
    scale = 1.0 / (D ** 0.5)

    # Largest divisor of T that is <= q_tile (avoids the whole-sequence tile).
    TQ = max(1, min(q_tile, T))
    while T % TQ != 0:
        TQ -= 1
    n_qt = T // TQ

    f32, bf16 = jnp.float32, jnp.bfloat16

    # ---- fold RoPE + softmax scale into the Q / K projections (trace time) ----
    R = jnp.asarray(_rope_fold_matrix(H, D))
    wqkv = params["wqkv"].astype(f32)
    bqkv = params["bqkv"].astype(f32)
    w_q = (wqkv[:, :C] @ R) * scale            # scale folded -> no per-step mul
    w_k = wqkv[:, C:2 * C] @ R
    w_v = wqkv[:, 2 * C:]
    b_q = (bqkv[:C] @ R) * scale
    b_k = bqkv[C:2 * C] @ R
    b_v = bqkv[2 * C:]

    # bf16 weights for the MXU (f32 accumulation inside the kernel).
    w_q_b = w_q.astype(bf16)                                       # (C, C)
    w_kv_b = jnp.concatenate([w_k, w_v], axis=1).astype(bf16)      # (C, 2C)
    w_fc_b = params["wfc"].astype(bf16)                            # (C, C)
    w1_b = params["w1"].astype(bf16)                               # (C, d_ff)
    w2_b = params["w2"].astype(bf16)                               # (d_ff, C)

    # Pack all (C,)-sized vectors into a single array (one DMA instead of nine).
    vec_c = jnp.stack(
        [b_q, b_k, b_v,
         params["bfc"].astype(f32),
         params["g1"].astype(f32), params["b1"].astype(f32),
         params["bb2"].astype(f32),
         params["g2"].astype(f32), params["b2"].astype(f32)],
        axis=0)                                                    # (9, C)
    vec_ff = params["bb1"].astype(f32).reshape(1, d_ff)            # (1, d_ff)
    B_Q, B_K, B_V, B_FC, G1, B1, BB2, G2, B2 = range(9)

    def kernel(x_ref, wq_ref, wkv_ref, wfc_ref, w1_ref, w2_ref,
               vec_ref, bff_ref, o_ref, q_scr, k_scr, v_scr):
        qt = pl.program_id(1)

        # ---- K/V for the whole sequence, once per batch element ----
        @pl.when(qt == 0)
        def _():
            xf = x_ref[0].astype(bf16)                                       # (T, C)
            kv = jnp.dot(xf, wkv_ref[...], preferred_element_type=f32)       # (T, 2C)
            k = kv[:, :C] + vec_ref[B_K]
            v = kv[:, C:] + vec_ref[B_V]
            # TODO(synk): (H, T, D) pads the lane dim to 128 when D < 128; a
            # lane-dense (T, C) scratch + einshape split would halve VMEM here.
            for h in range(H):                                               # lane slices only
                k_scr[h] = k[:, h * D:(h + 1) * D].astype(bf16)
                v_scr[h] = v[:, h * D:(h + 1) * D].astype(bf16)

        # ---- q-tile rows sliced from the already-resident full-sequence window ----
        row0 = pl.multiple_of(qt * TQ, TQ)
        x_f32 = x_ref[0, pl.ds(row0, TQ), :].astype(f32)                     # (TQ, C)
        x_bf = x_f32.astype(bf16)

        # ---- Q projection (RoPE + 1/sqrt(D) already folded into wq / b_q) ----
        q = jnp.dot(x_bf, wq_ref[...], preferred_element_type=f32) + vec_ref[B_Q]
        for h in range(H):
            q_scr[h] = q[:, h * D:(h + 1) * D].astype(bf16)                  # (H, TQ, D)

        # ---- batched per-head attention (one MXU pass per matmul) ----
        s = jnp.einsum("htd,hsd->hts", q_scr[...], k_scr[...],
                       preferred_element_type=f32)                           # (H, TQ, T)
        m = jnp.max(s, axis=-1, keepdims=True)
        # bf16 exp: bf16 EUP path on v6e/v7x; harmlessly legalized to f32 on v5e.
        p = jnp.exp((s - m).astype(bf16))                                    # (H, TQ, T) bf16
        l = jnp.sum(p, axis=-1, keepdims=True).astype(f32)                   # (H, TQ, 1)
        ctx = jnp.einsum("hts,hsd->htd", p, v_scr[...],
                         preferred_element_type=f32)                         # (H, TQ, D)
        # Normalize AFTER the P@V matmul (D-wide, not T-wide); approx recip = EUP.
        ctx = (ctx * pl.reciprocal(l, approx=True)).astype(bf16)
        # TODO(synk): replace the lane concat with a single (H,D,C) full-depth
        # contraction once multi-contracting-dim dot_general lowers on Mosaic.
        attn = jnp.concatenate([ctx[h] for h in range(H)], axis=-1)          # (TQ, C) bf16
        attn = jnp.dot(attn, wfc_ref[...],
                       preferred_element_type=f32) + vec_ref[B_FC]

        # ---- residual + LayerNorm 1 (f32) ----
        y = x_f32 + attn
        mu = jnp.mean(y, axis=-1, keepdims=True)
        var = jnp.mean((y - mu) ** 2, axis=-1, keepdims=True)
        y = (y - mu) * jax.lax.rsqrt(var + 1e-5) * vec_ref[G1] + vec_ref[B1]

        # ---- FFN: Linear -> exact GELU -> (Dropout = identity) -> Linear ----
        # TODO(synk): bf16 h1/GELU on v6e/v7x (keep f32 on v5e) per review.
        h1 = jnp.dot(y.astype(bf16), w1_ref[...], preferred_element_type=f32) + bff_ref[0]
        g = 0.5 * h1 * (1.0 + jax.lax.erf(h1 * 0.7071067811865475))
        # TODO(synk): Dropout(0.1) reproduced as identity (inference semantics).
        ff = jnp.dot(g.astype(bf16), w2_ref[...], preferred_element_type=f32) + vec_ref[BB2]

        # ---- residual + LayerNorm 2 (f32) ----
        z = y + ff
        mu2 = jnp.mean(z, axis=-1, keepdims=True)
        var2 = jnp.mean((z - mu2) ** 2, axis=-1, keepdims=True)
        z = (z - mu2) * jax.lax.rsqrt(var2 + 1e-5) * vec_ref[G2] + vec_ref[B2]

        o_ref[0] = z.astype(o_ref.dtype)

    weight_inputs = [w_q_b, w_kv_b, w_fc_b, w1_b, w2_b, vec_c, vec_ff]

    in_specs = [
        # x: full sequence for K/V; the q-tile is sliced from this window.
        pl.BlockSpec((1, T, C), lambda b, qt: (b, 0, 0)),
    ]
    for w in weight_inputs:
        # Constant block index -> single-buffered (no re-fetch, half the VMEM).
        in_specs.append(pl.BlockSpec(w.shape, lambda b, qt: (0, 0),
                                     pipeline_mode=pl.Buffered(1)))

    # Explicit VMEM budget; weights are single-buffered, x/out double-buffered.
    def nb(shape, dtype):
        return int(np.prod(shape)) * np.dtype(dtype).itemsize

    block_bytes = (
        2 * nb((1, T, C), x.dtype)                                   # x window
        + 2 * nb((1, TQ, C), x.dtype)                                # output window
        + sum(nb(w.shape, w.dtype) for w in weight_inputs)           # weights (1x)
        + nb((H, TQ, D), bf16) + 2 * nb((H, T, D), bf16)             # q/k/v scratch
        + nb((TQ, d_ff), jnp.float32)                                # FFN intermediate
        + 2 * nb((H, TQ, T), jnp.float32)                            # scores / exp
        + 4 * nb((TQ, C), jnp.float32)                               # misc intermediates
    )
    try:
        vmem_cap = int(pltpu.get_tpu_info().vmem_capacity_bytes)
    except Exception:
        vmem_cap = 64 << 20                                          # conservative fallback
    vmem_limit = int(min(max(block_bytes + (4 << 20), 32 << 20),
                         int(vmem_cap * 0.9)))                       # ~10% headroom

    return pl.pallas_call(
        kernel,
        out_shape=jax.ShapeDtypeStruct((B, T, C), x.dtype),
        grid_spec=pltpu.PrefetchScalarGridSpec(
            num_scalar_prefetch=0,
            grid=(B, n_qt),
            in_specs=in_specs,
            out_specs=pl.BlockSpec((1, TQ, C), lambda b, qt: (b, qt, 0)),
            scratch_shapes=[pltpu.VMEM((H, TQ, D), bf16),
                            pltpu.VMEM((H, T, D), bf16),
                            pltpu.VMEM((H, T, D), bf16)],
        ),
        compiler_params=pltpu.CompilerParams(
            # q-tile axis carries the K/V scratch -> must stay "arbitrary".
            dimension_semantics=("parallel", "arbitrary"),
            vmem_limit_bytes=vmem_limit,
        ),
    )(x, *weight_inputs)


def encoder_block_reference(x, params, *, num_heads):
    """Pure-JAX (f32) mirror of the PyTorch forward (for verification)."""
    B, T, C = x.shape
    depth = C // num_heads

    qkv = x @ params["wqkv"] + params["bqkv"]                      # (B, T, 3C)
    qkv = qkv.reshape(B, T, 3, num_heads, depth).transpose(2, 0, 3, 1, 4)
    q, k, v = qkv[0], qkv[1], qkv[2]                               # (B, H, T, D)

    def rope(xh):
        seq_len = xh.shape[1]                                      # = num_heads (quirk)
        inv_freq = 1.0 / (10000.0 ** (jnp.arange(0, depth, 2, dtype=jnp.float32) / depth))
        freqs = jnp.outer(jnp.arange(seq_len, dtype=jnp.float32), inv_freq)
        sin, cos = jnp.sin(freqs)[:, None, :], jnp.cos(freqs)[:, None, :]
        x1, x2 = xh[..., ::2], xh[..., 1::2]
        x_rot = jnp.stack([x1 * cos - x2 * sin, x1 * sin + x2 * cos], axis=-1)
        return x_rot.reshape(xh.shape)

    q, k = rope(q), rope(k)
    scores = (q @ jnp.swapaxes(k, -2, -1)) / (depth ** 0.5)
    attn = jax.nn.softmax(scores, axis=-1)
    out = (attn @ v).transpose(0, 2, 1, 3).reshape(B, T, C)
    out = out @ params["wfc"] + params["bfc"]

    def layernorm(y, g, b):
        mu = jnp.mean(y, axis=-1, keepdims=True)
        var = jnp.mean((y - mu) ** 2, axis=-1, keepdims=True)
        return (y - mu) / jnp.sqrt(var + 1e-5) * g + b

    y = layernorm(x + out, params["g1"], params["b1"])
    h1 = y @ params["w1"] + params["bb1"]
    g = 0.5 * h1 * (1.0 + jax.lax.erf(h1 / jnp.sqrt(2.0)))
    ff = g @ params["w2"] + params["bb2"]
    return layernorm(y + ff, params["g2"], params["b2"])


def init_params(key, d_model, d_ff):
    ks = jax.random.split(key, 6)
    s = 0.1
    return {
        "wqkv": s * jax.random.normal(ks[0], (d_model, 3 * d_model), jnp.float32),
        "bqkv": s * jax.random.normal(ks[1], (3 * d_model,), jnp.float32),
        "wfc": s * jax.random.normal(ks[2], (d_model, d_model), jnp.float32),
        "bfc": s * jax.random.normal(ks[3], (d_model,), jnp.float32),
        "g1": jnp.ones((d_model,), jnp.float32),
        "b1": jnp.zeros((d_model,), jnp.float32),
        "w1": s * jax.random.normal(ks[4], (d_model, d_ff), jnp.float32),
        "bb1": jnp.zeros((d_ff,), jnp.float32),
        "w2": s * jax.random.normal(ks[5], (d_ff, d_model), jnp.float32),
        "bb2": jnp.zeros((d_model,), jnp.float32),
        "g2": jnp.ones((d_model,), jnp.float32),
        "b2": jnp.zeros((d_model,), jnp.float32),
    }


if __name__ == "__main__":
    B, T, d_model, num_heads, d_ff = 2, 8, 32, 4, 64

    key = jax.random.PRNGKey(0)
    kx, kp = jax.random.split(key)
    x = jax.random.normal(kx, (B, T, d_model), jnp.float32)
    params = init_params(kp, d_model, d_ff)

    run = jax.jit(functools.partial(encoder_block_pallas, num_heads=num_heads))
    out = run(x, params)
    out = jax.block_until_ready(out)

    ref = encoder_block_reference(x, params, num_heads=num_heads)
    # Tolerance relaxed vs. the pure-f32 reference: bf16 MXU inputs (f32
    # accumulation), bf16 softmax exp, and an approx reciprocal in the softmax.
    np.testing.assert_allclose(np.asarray(out), np.asarray(ref), rtol=5e-2, atol=5e-2)

    print("KERNEL_OK")
</pallas_src>

<mosaic_0001>
module attributes {stable_mosaic.version = 11 : i64} {
  func.func @kernel(%arg0: i32, %arg1: i32, %arg2: memref<1x8x32xf32, #tpu.memory_space<vmem>>, %arg3: memref<32x32xbf16, #tpu.memory_space<vmem>>, %arg4: memref<32x64xbf16, #tpu.memory_space<vmem>>, %arg5: memref<32x32xbf16, #tpu.memory_space<vmem>>, %arg6: memref<32x64xbf16, #tpu.memory_space<vmem>>, %arg7: memref<64x32xbf16, #tpu.memory_space<vmem>>, %arg8: memref<9x32xf32, #tpu.memory_space<vmem>>, %arg9: memref<1x64xf32, #tpu.memory_space<vmem>>, %arg10: memref<1x8x32xf32, #tpu.memory_space<vmem>>, %arg11: memref<4x8x8xbf16, #tpu.memory_space<vmem>>, %arg12: memref<4x8x8xbf16, #tpu.memory_space<vmem>>, %arg13: memref<4x8x8xbf16, #tpu.memory_space<vmem>>) attributes {dimension_semantics = [#tpu.dimension_semantics<parallel>, #tpu.dimension_semantics<arbitrary>], iteration_bounds = array<i64: 2, 1>, scalar_prefetch = 0 : i64, scratch_operands = 3 : i64, tpu.core_type = #tpu.core_type<tc>, window_params = [{transform_indices = @transform_0, window_bounds = array<i64: 1, 8, 32>}, {pipeline_mode = #tpu.pipeline_mode<synchronous>, transform_indices = @transform_1, window_bounds = array<i64: 32, 32>}, {pipeline_mode = #tpu.pipeline_mode<synchronous>, transform_indices = @transform_2, window_bounds = array<i64: 32, 64>}, {pipeline_mode = #tpu.pipeline_mode<synchronous>, transform_indices = @transform_3, window_bounds = array<i64: 32, 32>}, {pipeline_mode = #tpu.pipeline_mode<synchronous>, transform_indices = @transform_4, window_bounds = array<i64: 32, 64>}, {pipeline_mode = #tpu.pipeline_mode<synchronous>, transform_indices = @transform_5, window_bounds = array<i64: 64, 32>}, {pipeline_mode = #tpu.pipeline_mode<synchronous>, transform_indices = @transform_6, window_bounds = array<i64: 9, 32>}, {pipeline_mode = #tpu.pipeline_mode<synchronous>, transform_indices = @transform_7, window_bounds = array<i64: 1, 64>}, {transform_indices = @transform_8, window_bounds = array<i64: 1, 8, 32>}]} {
    %c0_i32 = arith.constant 0 : i32
    %0 = arith.cmpi eq, %arg1, %c0_i32 : i32
    %1 = arith.extui %0 : i1 to i32
    %c0_i32_0 = arith.constant 0 : i32
    %2 = arith.cmpi ne, %1, %c0_i32_0 : i32
    scf.if %2 {
      %c0_62 = arith.constant 0 : index
      %c0_63 = arith.constant 0 : index
      %c0_64 = arith.constant 0 : index
      %157 = vector.load %arg2[%c0_62, %c0_63, %c0_64] : memref<1x8x32xf32, #tpu.memory_space<vmem>>, vector<1x8x32xf32>
      %158 = vector.shape_cast %157 : vector<1x8x32xf32> to vector<8x32xf32>
      %159 = arith.truncf %158 : vector<8x32xf32> to vector<8x32xbf16>
      %c0_65 = arith.constant 0 : index
      %c0_66 = arith.constant 0 : index
      %160 = vector.load %arg4[%c0_65, %c0_66] : memref<32x64xbf16, #tpu.memory_space<vmem>>, vector<32x64xbf16>
      %cst_67 = arith.constant dense<0.000000e+00> : vector<8x64xf32>
      %161 = tpu.matmul %159, %160, %cst_67 {dimension_numbers = #tpu.dot_dimension_numbers<[1], [0], [0], [1], [0, 0, 1, 1], [], []>} : vector<8x32xbf16>, vector<32x64xbf16>, vector<8x64xf32> -> vector<8x64xf32>
      %162 = vector.extract_strided_slice %161 {offsets = [0, 0], sizes = [8, 32], strides = [1, 1]} : vector<8x64xf32> to vector<8x32xf32>
      %c1_68 = arith.constant 1 : index
      %c0_69 = arith.constant 0 : index
      %163 = vector.load %arg8[%c1_68, %c0_69] : memref<9x32xf32, #tpu.memory_space<vmem>>, vector<1x32xf32>
      %164 = vector.shape_cast %163 : vector<1x32xf32> to vector<32xf32>
      %165 = vector.shape_cast %164 : vector<32xf32> to vector<1x32xf32>
      %166 = vector.broadcast %165 : vector<1x32xf32> to vector<8x32xf32>
      %167 = arith.addf %162, %166 : vector<8x32xf32>
      %168 = vector.extract_strided_slice %161 {offsets = [0, 32], sizes = [8, 32], strides = [1, 1]} : vector<8x64xf32> to vector<8x32xf32>
      %c2_70 = arith.constant 2 : index
      %c0_71 = arith.constant 0 : index
      %169 = vector.load %arg8[%c2_70, %c0_71] : memref<9x32xf32, #tpu.memory_space<vmem>>, vector<1x32xf32>
      %170 = vector.shape_cast %169 : vector<1x32xf32> to vector<32xf32>
      %171 = vector.shape_cast %170 : vector<32xf32> to vector<1x32xf32>
      %172 = vector.broadcast %171 : vector<1x32xf32> to vector<8x32xf32>
      %173 = arith.addf %168, %172 : vector<8x32xf32>
      %174 = vector.extract_strided_slice %167 {offsets = [0, 0], sizes = [8, 8], strides = [1, 1]} : vector<8x32xf32> to vector<8x8xf32>
      %175 = arith.truncf %174 : vector<8x8xf32> to vector<8x8xbf16>
      %c0_72 = arith.constant 0 : index
      %c0_73 = arith.constant 0 : index
      %c0_74 = arith.constant 0 : index
      %176 = vector.load %arg12[%c0_72, %c0_73, %c0_74] : memref<4x8x8xbf16, #tpu.memory_space<vmem>>, vector<1x8x8xbf16>
      %177 = vector.shape_cast %176 : vector<1x8x8xbf16> to vector<8x8xbf16>
      %178 = vector.shape_cast %175 : vector<8x8xbf16> to vector<1x8x8xbf16>
      tpu.vector_store %arg12[%c0_72, %c0_73, %c0_74], %178 {strides = array<i32>} : memref<4x8x8xbf16, #tpu.memory_space<vmem>>, vector<1x8x8xbf16>,
      %179 = vector.extract_strided_slice %173 {offsets = [0, 0], sizes = [8, 8], strides = [1, 1]} : vector<8x32xf32> to vector<8x8xf32>
      %180 = arith.truncf %179 : vector<8x8xf32> to vector<8x8xbf16>
      %c0_75 = arith.constant 0 : index
      %c0_76 = arith.constant 0 : index
      %c0_77 = arith.constant 0 : index
      %181 = vector.load %arg13[%c0_75, %c0_76, %c0_77] : memref<4x8x8xbf16, #tpu.memory_space<vmem>>, vector<1x8x8xbf16>
      %182 = vector.shape_cast %181 : vector<1x8x8xbf16> to vector<8x8xbf16>
      %183 = vector.shape_cast %180 : vector<8x8xbf16> to vector<1x8x8xbf16>
      tpu.vector_store %arg13[%c0_75, %c0_76, %c0_77], %183 {strides = array<i32>} : memref<4x8x8xbf16, #tpu.memory_space<vmem>>, vector<1x8x8xbf16>,
      %184 = vector.extract_strided_slice %167 {offsets = [0, 8], sizes = [8, 8], strides = [1, 1]} : vector<8x32xf32> to vector<8x8xf32>
      %185 = arith.truncf %184 : vector<8x8xf32> to vector<8x8xbf16>
      %c1_78 = arith.constant 1 : index
      %c0_79 = arith.constant 0 : index
      %c0_80 = arith.constant 0 : index
      %186 = vector.load %arg12[%c1_78, %c0_79, %c0_80] : memref<4x8x8xbf16, #tpu.memory_space<vmem>>, vector<1x8x8xbf16>
      %187 = vector.shape_cast %186 : vector<1x8x8xbf16> to vector<8x8xbf16>
      %188 = vector.shape_cast %185 : vector<8x8xbf16> to vector<1x8x8xbf16>
      tpu.vector_store %arg12[%c1_78, %c0_79, %c0_80], %188 {strides = array<i32>} : memref<4x8x8xbf16, #tpu.memory_space<vmem>>, vector<1x8x8xbf16>,
      %189 = vector.extract_strided_slice %173 {offsets = [0, 8], sizes = [8, 8], strides = [1, 1]} : vector<8x32xf32> to vector<8x8xf32>
      %190 = arith.truncf %189 : vector<8x8xf32> to vector<8x8xbf16>
      %c1_81 = arith.constant 1 : index
      %c0_82 = arith.constant 0 : index
      %c0_83 = arith.constant 0 : index
      %191 = vector.load %arg13[%c1_81, %c0_82, %c0_83] : memref<4x8x8xbf16, #tpu.memory_space<vmem>>, vector<1x8x8xbf16>
      %192 = vector.shape_cast %191 : vector<1x8x8xbf16> to vector<8x8xbf16>
      %193 = vector.shape_cast %190 : vector<8x8xbf16> to vector<1x8x8xbf16>
      tpu.vector_store %arg13[%c1_81, %c0_82, %c0_83], %193 {strides = array<i32>} : memref<4x8x8xbf16, #tpu.memory_space<vmem>>, vector<1x8x8xbf16>,
      %194 = vector.extract_strided_slice %167 {offsets = [0, 16], sizes = [8, 8], strides = [1, 1]} : vector<8x32xf32> to vector<8x8xf32>
      %195 = arith.truncf %194 : vector<8x8xf32> to vector<8x8xbf16>
      %c2_84 = arith.constant 2 : index
      %c0_85 = arith.constant 0 : index
      %c0_86 = arith.constant 0 : index
      %196 = vector.load %arg12[%c2_84, %c0_85, %c0_86] : memref<4x8x8xbf16, #tpu.memory_space<vmem>>, vector<1x8x8xbf16>
      %197 = vector.shape_cast %196 : vector<1x8x8xbf16> to vector<8x8xbf16>
      %198 = vector.shape_cast %195 : vector<8x8xbf16> to vector<1x8x8xbf16>
      tpu.vector_store %arg12[%c2_84, %c0_85, %c0_86], %198 {strides = array<i32>} : memref<4x8x8xbf16, #tpu.memory_space<vmem>>, vector<1x8x8xbf16>,
      %199 = vector.extract_strided_slice %173 {offsets = [0, 16], sizes = [8, 8], strides = [1, 1]} : vector<8x32xf32> to vector<8x8xf32>
      %200 = arith.truncf %199 : vector<8x8xf32> to vector<8x8xbf16>
      %c2_87 = arith.constant 2 : index
      %c0_88 = arith.constant 0 : index
      %c0_89 = arith.constant 0 : index
      %201 = vector.load %arg13[%c2_87, %c0_88, %c0_89] : memref<4x8x8xbf16, #tpu.memory_space<vmem>>, vector<1x8x8xbf16>
      %202 = vector.shape_cast %201 : vector<1x8x8xbf16> to vector<8x8xbf16>
      %203 = vector.shape_cast %200 : vector<8x8xbf16> to vector<1x8x8xbf16>
      tpu.vector_store %arg13[%c2_87, %c0_88, %c0_89], %203 {strides = array<i32>} : memref<4x8x8xbf16, #tpu.memory_space<vmem>>, vector<1x8x8xbf16>,
      %204 = vector.extract_strided_slice %167 {offsets = [0, 24], sizes = [8, 8], strides = [1, 1]} : vector<8x32xf32> to vector<8x8xf32>
      %205 = arith.truncf %204 : vector<8x8xf32> to vector<8x8xbf16>
      %c3_90 = arith.constant 3 : index
      %c0_91 = arith.constant 0 : index
      %c0_92 = arith.constant 0 : index
      %206 = vector.load %arg12[%c3_90, %c0_91, %c0_92] : memref<4x8x8xbf16, #tpu.memory_space<vmem>>, vector<1x8x8xbf16>
      %207 = vector.shape_cast %206 : vector<1x8x8xbf16> to vector<8x8xbf16>
      %208 = vector.shape_cast %205 : vector<8x8xbf16> to vector<1x8x8xbf16>
      tpu.vector_store %arg12[%c3_90, %c0_91, %c0_92], %208 {strides = array<i32>} : memref<4x8x8xbf16, #tpu.memory_space<vmem>>, vector<1x8x8xbf16>,
      %209 = vector.extract_strided_slice %173 {offsets = [0, 24], sizes = [8, 8], strides = [1, 1]} : vector<8x32xf32> to vector<8x8xf32>
      %210 = arith.truncf %209 : vector<8x8xf32> to vector<8x8xbf16>
      %c3_93 = arith.constant 3 : index
      %c0_94 = arith.constant 0 : index
      %c0_95 = arith.constant 0 : index
      %211 = vector.load %arg13[%c3_93, %c0_94, %c0_95] : memref<4x8x8xbf16, #tpu.memory_space<vmem>>, vector<1x8x8xbf16>
      %212 = vector.shape_cast %211 : vector<1x8x8xbf16> to vector<8x8xbf16>
      %213 = vector.shape_cast %210 : vector<8x8xbf16> to vector<1x8x8xbf16>
      tpu.vector_store %arg13[%c3_93, %c0_94, %c0_95], %213 {strides = array<i32>} : memref<4x8x8xbf16, #tpu.memory_space<vmem>>, vector<1x8x8xbf16>,
    } else {
    }
    %c8_i32 = arith.constant 8 : i32
    %3 = arith.muli %arg1, %c8_i32 : i32
    %4 = tpu.assume_multiple %3, 8 : i32
    %c0 = arith.constant 0 : index
    %5 = arith.index_cast %4 : i32 to index
    %c0_1 = arith.constant 0 : index
    %6 = vector.load %arg2[%c0, %5, %c0_1] : memref<1x8x32xf32, #tpu.memory_space<vmem>>, vector<1x8x32xf32>
    %7 = vector.shape_cast %6 : vector<1x8x32xf32> to vector<8x32xf32>
    %8 = arith.truncf %7 : vector<8x32xf32> to vector<8x32xbf16>
    %c0_2 = arith.constant 0 : index
    %c0_3 = arith.constant 0 : index
    %9 = vector.load %arg3[%c0_2, %c0_3] : memref<32x32xbf16, #tpu.memory_space<vmem>>, vector<32x32xbf16>
    %cst = arith.constant dense<0.000000e+00> : vector<8x32xf32>
    %10 = tpu.matmul %8, %9, %cst {dimension_numbers = #tpu.dot_dimension_numbers<[1], [0], [0], [1], [0, 0, 1, 1], [], []>} : vector<8x32xbf16>, vector<32x32xbf16>, vector<8x32xf32> -> vector<8x32xf32>
    %c0_4 = arith.constant 0 : index
    %c0_5 = arith.constant 0 : index
    %11 = vector.load %arg8[%c0_4, %c0_5] : memref<9x32xf32, #tpu.memory_space<vmem>>, vector<1x32xf32>
    %12 = vector.shape_cast %11 : vector<1x32xf32> to vector<32xf32>
    %13 = vector.shape_cast %12 : vector<32xf32> to vector<1x32xf32>
    %14 = vector.broadcast %13 : vector<1x32xf32> to vector<8x32xf32>
    %15 = arith.addf %10, %14 : vector<8x32xf32>
    %16 = vector.extract_strided_slice %15 {offsets = [0, 0], sizes = [8, 8], strides = [1, 1]} : vector<8x32xf32> to vector<8x8xf32>
    %17 = arith.truncf %16 : vector<8x8xf32> to vector<8x8xbf16>
    %c0_6 = arith.constant 0 : index
    %c0_7 = arith.constant 0 : index
    %c0_8 = arith.constant 0 : index
    %18 = vector.load %arg11[%c0_6, %c0_7, %c0_8] : memref<4x8x8xbf16, #tpu.memory_space<vmem>>, vector<1x8x8xbf16>
    %19 = vector.shape_cast %18 : vector<1x8x8xbf16> to vector<8x8xbf16>
    %20 = vector.shape_cast %17 : vector<8x8xbf16> to vector<1x8x8xbf16>
    tpu.vector_store %arg11[%c0_6, %c0_7, %c0_8], %20 {strides = array<i32>} : memref<4x8x8xbf16, #tpu.memory_space<vmem>>, vector<1x8x8xbf16>,
    %21 = vector.extract_strided_slice %15 {offsets = [0, 8], sizes = [8, 8], strides = [1, 1]} : vector<8x32xf32> to vector<8x8xf32>
    %22 = arith.truncf %21 : vector<8x8xf32> to vector<8x8xbf16>
    %c1 = arith.constant 1 : index
    %c0_9 = arith.constant 0 : index
    %c0_10 = arith.constant 0 : index
    %23 = vector.load %arg11[%c1, %c0_9, %c0_10] : memref<4x8x8xbf16, #tpu.memory_space<vmem>>, vector<1x8x8xbf16>
    %24 = vector.shape_cast %23 : vector<1x8x8xbf16> to vector<8x8xbf16>
    %25 = vector.shape_cast %22 : vector<8x8xbf16> to vector<1x8x8xbf16>
    tpu.vector_store %arg11[%c1, %c0_9, %c0_10], %25 {strides = array<i32>} : memref<4x8x8xbf16, #tpu.memory_space<vmem>>, vector<1x8x8xbf16>,
    %26 = vector.extract_strided_slice %15 {offsets = [0, 16], sizes = [8, 8], strides = [1, 1]} : vector<8x32xf32> to vector<8x8xf32>
    %27 = arith.truncf %26 : vector<8x8xf32> to vector<8x8xbf16>
    %c2 = arith.constant 2 : index
    %c0_11 = arith.constant 0 : index
    %c0_12 = arith.constant 0 : index
    %28 = vector.load %arg11[%c2, %c0_11, %c0_12] : memref<4x8x8xbf16, #tpu.memory_space<vmem>>, vector<1x8x8xbf16>
    %29 = vector.shape_cast %28 : vector<1x8x8xbf16> to vector<8x8xbf16>
    %30 = vector.shape_cast %27 : vector<8x8xbf16> to vector<1x8x8xbf16>
    tpu.vector_store %arg11[%c2, %c0_11, %c0_12], %30 {strides = array<i32>} : memref<4x8x8xbf16, #tpu.memory_space<vmem>>, vector<1x8x8xbf16>,
    %31 = vector.extract_strided_slice %15 {offsets = [0, 24], sizes = [8, 8], strides = [1, 1]} : vector<8x32xf32> to vector<8x8xf32>
    %32 = arith.truncf %31 : vector<8x8xf32> to vector<8x8xbf16>
    %c3 = arith.constant 3 : index
    %c0_13 = arith.constant 0 : index
    %c0_14 = arith.constant 0 : index
    %33 = vector.load %arg11[%c3, %c0_13, %c0_14] : memref<4x8x8xbf16, #tpu.memory_space<vmem>>, vector<1x8x8xbf16>
    %34 = vector.shape_cast %33 : vector<1x8x8xbf16> to vector<8x8xbf16>
    %35 = vector.shape_cast %32 : vector<8x8xbf16> to vector<1x8x8xbf16>
    tpu.vector_store %arg11[%c3, %c0_13, %c0_14], %35 {strides = array<i32>} : memref<4x8x8xbf16, #tpu.memory_space<vmem>>, vector<1x8x8xbf16>,
    %c0_15 = arith.constant 0 : index
    %c0_16 = arith.constant 0 : index
    %c0_17 = arith.constant 0 : index
    %36 = vector.load %arg11[%c0_15, %c0_16, %c0_17] : memref<4x8x8xbf16, #tpu.memory_space<vmem>>, vector<4x8x8xbf16>
    %c0_18 = arith.constant 0 : index
    %c0_19 = arith.constant 0 : index
    %c0_20 = arith.constant 0 : index
    %37 = vector.load %arg12[%c0_18, %c0_19, %c0_20] : memref<4x8x8xbf16, #tpu.memory_space<vmem>>, vector<4x8x8xbf16>
    "tpu.trace_start"() <{level = 10 : i32, message = "htd,hsd->hts"}> : () -> ()
    %cst_21 = arith.constant dense<0.000000e+00> : vector<4x8x8xf32>
    %38 = tpu.matmul %36, %37, %cst_21 {dimension_numbers = #tpu.dot_dimension_numbers<[2], [2], [1], [1], [0, 0, 0, 1, 1, 1], [0], [0]>} : vector<4x8x8xbf16>, vector<4x8x8xbf16>, vector<4x8x8xf32> -> vector<4x8x8xf32>
    "tpu.trace_stop"() : () -> ()
    %cst_22 = arith.constant dense<0xFF800000> : vector<4x8xf32>
    %39 = vector.multi_reduction <maximumf>, %38, %cst_22 [2] : vector<4x8x8xf32> to vector<4x8xf32>
    %40 = vector.shape_cast %39 : vector<4x8xf32> to vector<4x8x1xf32>
    %41 = vector.broadcast %40 : vector<4x8x1xf32> to vector<4x8x8xf32>
    %42 = arith.subf %38, %41 : vector<4x8x8xf32>
    %43 = arith.truncf %42 : vector<4x8x8xf32> to vector<4x8x8xbf16>
    %44 = math.exp %43 : vector<4x8x8xbf16>
    %45 = arith.extf %44 : vector<4x8x8xbf16> to vector<4x8x8xf32>
    %cst_23 = arith.constant dense<0.000000e+00> : vector<4x8xf32>
    %46 = vector.multi_reduction <add>, %45, %cst_23 [2] : vector<4x8x8xf32> to vector<4x8xf32>
    %47 = vector.shape_cast %46 : vector<4x8xf32> to vector<4x8x1xf32>
    %48 = arith.truncf %47 : vector<4x8x1xf32> to vector<4x8x1xbf16>
    %49 = arith.extf %48 : vector<4x8x1xbf16> to vector<4x8x1xf32>
    %c0_24 = arith.constant 0 : index
    %c0_25 = arith.constant 0 : index
    %c0_26 = arith.constant 0 : index
    %50 = vector.load %arg13[%c0_24, %c0_25, %c0_26] : memref<4x8x8xbf16, #tpu.memory_space<vmem>>, vector<4x8x8xbf16>
    "tpu.trace_start"() <{level = 10 : i32, message = "hts,hsd->htd"}> : () -> ()
    %cst_27 = arith.constant dense<0.000000e+00> : vector<4x8x8xf32>
    %51 = tpu.matmul %44, %50, %cst_27 {dimension_numbers = #tpu.dot_dimension_numbers<[2], [1], [1], [2], [0, 0, 0, 1, 1, 2], [0], [0]>} : vector<4x8x8xbf16>, vector<4x8x8xbf16>, vector<4x8x8xf32> -> vector<4x8x8xf32>
    "tpu.trace_stop"() : () -> ()
    %52 = tpu.reciprocal %49 {approx = true} : vector<4x8x1xf32> -> vector<4x8x1xf32>
    %53 = vector.broadcast %52 : vector<4x8x1xf32> to vector<4x8x8xf32>
    %54 = arith.mulf %51, %53 : vector<4x8x8xf32>
    %55 = arith.truncf %54 : vector<4x8x8xf32> to vector<4x8x8xbf16>
    %56 = vector.extract_strided_slice %55 {offsets = [0, 0, 0], sizes = [1, 8, 8], strides = [1, 1, 1]} : vector<4x8x8xbf16> to vector<1x8x8xbf16>
    %57 = vector.shape_cast %56 : vector<1x8x8xbf16> to vector<8x8xbf16>
    %58 = vector.extract_strided_slice %55 {offsets = [1, 0, 0], sizes = [1, 8, 8], strides = [1, 1, 1]} : vector<4x8x8xbf16> to vector<1x8x8xbf16>
    %59 = vector.shape_cast %58 : vector<1x8x8xbf16> to vector<8x8xbf16>
    %60 = vector.extract_strided_slice %55 {offsets = [2, 0, 0], sizes = [1, 8, 8], strides = [1, 1, 1]} : vector<4x8x8xbf16> to vector<1x8x8xbf16>
    %61 = vector.shape_cast %60 : vector<1x8x8xbf16> to vector<8x8xbf16>
    %62 = vector.extract_strided_slice %55 {offsets = [3, 0, 0], sizes = [1, 8, 8], strides = [1, 1, 1]} : vector<4x8x8xbf16> to vector<1x8x8xbf16>
    %63 = vector.shape_cast %62 : vector<1x8x8xbf16> to vector<8x8xbf16>
    %64 = tpu.concatenate %57, %59, %61, %63 in 1 : vector<8x8xbf16>, vector<8x8xbf16>, vector<8x8xbf16>, vector<8x8xbf16> -> vector<8x32xbf16>
    %c0_28 = arith.constant 0 : index
    %c0_29 = arith.constant 0 : index
    %65 = vector.load %arg5[%c0_28, %c0_29] : memref<32x32xbf16, #tpu.memory_space<vmem>>, vector<32x32xbf16>
    %cst_30 = arith.constant dense<0.000000e+00> : vector<8x32xf32>
    %66 = tpu.matmul %64, %65, %cst_30 {dimension_numbers = #tpu.dot_dimension_numbers<[1], [0], [0], [1], [0, 0, 1, 1], [], []>} : vector<8x32xbf16>, vector<32x32xbf16>, vector<8x32xf32> -> vector<8x32xf32>
    %c3_31 = arith.constant 3 : index
    %c0_32 = arith.constant 0 : index
    %67 = vector.load %arg8[%c3_31, %c0_32] : memref<9x32xf32, #tpu.memory_space<vmem>>, vector<1x32xf32>
    %68 = vector.shape_cast %67 : vector<1x32xf32> to vector<32xf32>
    %69 = vector.shape_cast %68 : vector<32xf32> to vector<1x32xf32>
    %70 = vector.broadcast %69 : vector<1x32xf32> to vector<8x32xf32>
    %71 = arith.addf %66, %70 : vector<8x32xf32>
    %72 = arith.addf %7, %71 : vector<8x32xf32>
    %cst_33 = arith.constant dense<0.000000e+00> : vector<8xf32>
    %73 = vector.multi_reduction <add>, %72, %cst_33 [1] : vector<8x32xf32> to vector<8xf32>
    %74 = vector.shape_cast %73 : vector<8xf32> to vector<8x1xf32>
    %cst_34 = arith.constant 3.200000e+01 : f32
    %75 = vector.broadcast %cst_34 : f32 to vector<8x1xf32>
    %76 = arith.divf %74, %75 : vector<8x1xf32>
    %77 = vector.broadcast %76 : vector<8x1xf32> to vector<8x32xf32>
    %78 = arith.subf %72, %77 : vector<8x32xf32>
    %79 = arith.mulf %78, %78 : vector<8x32xf32>
    %cst_35 = arith.constant dense<0.000000e+00> : vector<8xf32>
    %80 = vector.multi_reduction <add>, %79, %cst_35 [1] : vector<8x32xf32> to vector<8xf32>
    %81 = vector.shape_cast %80 : vector<8xf32> to vector<8x1xf32>
    %cst_36 = arith.constant 3.200000e+01 : f32
    %82 = vector.broadcast %cst_36 : f32 to vector<8x1xf32>
    %83 = arith.divf %81, %82 : vector<8x1xf32>
    %84 = vector.broadcast %76 : vector<8x1xf32> to vector<8x32xf32>
    %85 = arith.subf %72, %84 : vector<8x32xf32>
    %cst_37 = arith.constant 9.99999974E-6 : f32
    %86 = vector.broadcast %cst_37 : f32 to vector<8x1xf32>
    %87 = arith.addf %83, %86 : vector<8x1xf32>
    %88 = math.rsqrt %87 : vector<8x1xf32>
    %89 = vector.broadcast %88 : vector<8x1xf32> to vector<8x32xf32>
    %90 = arith.mulf %85, %89 : vector<8x32xf32>
    %c4 = arith.constant 4 : index
    %c0_38 = arith.constant 0 : index
    %91 = vector.load %arg8[%c4, %c0_38] : memref<9x32xf32, #tpu.memory_space<vmem>>, vector<1x32xf32>
    %92 = vector.shape_cast %91 : vector<1x32xf32> to vector<32xf32>
    %93 = vector.shape_cast %92 : vector<32xf32> to vector<1x32xf32>
    %94 = vector.broadcast %93 : vector<1x32xf32> to vector<8x32xf32>
    %95 = arith.mulf %90, %94 : vector<8x32xf32>
    %c5 = arith.constant 5 : index
    %c0_39 = arith.constant 0 : index
    %96 = vector.load %arg8[%c5, %c0_39] : memref<9x32xf32, #tpu.memory_space<vmem>>, vector<1x32xf32>
    %97 = vector.shape_cast %96 : vector<1x32xf32> to vector<32xf32>
    %98 = vector.shape_cast %97 : vector<32xf32> to vector<1x32xf32>
    %99 = vector.broadcast %98 : vector<1x32xf32> to vector<8x32xf32>
    %100 = arith.addf %95, %99 : vector<8x32xf32>
    %101 = arith.truncf %100 : vector<8x32xf32> to vector<8x32xbf16>
    %c0_40 = arith.constant 0 : index
    %c0_41 = arith.constant 0 : index
    %102 = vector.load %arg6[%c0_40, %c0_41] : memref<32x64xbf16, #tpu.memory_space<vmem>>, vector<32x64xbf16>
    %cst_42 = arith.constant dense<0.000000e+00> : vector<8x64xf32>
    %103 = tpu.matmul %101, %102, %cst_42 {dimension_numbers = #tpu.dot_dimension_numbers<[1], [0], [0], [1], [0, 0, 1, 1], [], []>} : vector<8x32xbf16>, vector<32x64xbf16>, vector<8x64xf32> -> vector<8x64xf32>
    %c0_43 = arith.constant 0 : index
    %c0_44 = arith.constant 0 : index
    %104 = vector.load %arg9[%c0_43, %c0_44] : memref<1x64xf32, #tpu.memory_space<vmem>>, vector<1x64xf32>
    %105 = vector.shape_cast %104 : vector<1x64xf32> to vector<64xf32>
    %106 = vector.shape_cast %105 : vector<64xf32> to vector<1x64xf32>
    %107 = vector.broadcast %106 : vector<1x64xf32> to vector<8x64xf32>
    %108 = arith.addf %103, %107 : vector<8x64xf32>
    %cst_45 = arith.constant 5.000000e-01 : f32
    %109 = vector.broadcast %cst_45 : f32 to vector<8x64xf32>
    %110 = arith.mulf %109, %108 : vector<8x64xf32>
    %cst_46 = arith.constant 0.707106769 : f32
    %111 = vector.broadcast %cst_46 : f32 to vector<8x64xf32>
    %112 = arith.mulf %108, %111 : vector<8x64xf32>
    %113 = math.erf %112 : vector<8x64xf32>
    %cst_47 = arith.constant 1.000000e+00 : f32
    %114 = vector.broadcast %cst_47 : f32 to vector<8x64xf32>
    %115 = arith.addf %114, %113 : vector<8x64xf32>
    %116 = arith.mulf %110, %115 : vector<8x64xf32>
    %117 = arith.truncf %116 : vector<8x64xf32> to vector<8x64xbf16>
    %c0_48 = arith.constant 0 : index
    %c0_49 = arith.constant 0 : index
    %118 = vector.load %arg7[%c0_48, %c0_49] : memref<64x32xbf16, #tpu.memory_space<vmem>>, vector<64x32xbf16>
    %cst_50 = arith.constant dense<0.000000e+00> : vector<8x32xf32>
    %119 = tpu.matmul %117, %118, %cst_50 {dimension_numbers = #tpu.dot_dimension_numbers<[1], [0], [0], [1], [0, 0, 1, 1], [], []>} : vector<8x64xbf16>, vector<64x32xbf16>, vector<8x32xf32> -> vector<8x32xf32>
    %c6 = arith.constant 6 : index
    %c0_51 = arith.constant 0 : index
    %120 = vector.load %arg8[%c6, %c0_51] : memref<9x32xf32, #tpu.memory_space<vmem>>, vector<1x32xf32>
    %121 = vector.shape_cast %120 : vector<1x32xf32> to vector<32xf32>
    %122 = vector.shape_cast %121 : vector<32xf32> to vector<1x32xf32>
    %123 = vector.broadcast %122 : vector<1x32xf32> to vector<8x32xf32>
    %124 = arith.addf %119, %123 : vector<8x32xf32>
    %125 = arith.addf %100, %124 : vector<8x32xf32>
    %cst_52 = arith.constant dense<0.000000e+00> : vector<8xf32>
    %126 = vector.multi_reduction <add>, %125, %cst_52 [1] : vector<8x32xf32> to vector<8xf32>
    %127 = vector.shape_cast %126 : vector<8xf32> to vector<8x1xf32>
    %cst_53 = arith.constant 3.200000e+01 : f32
    %128 = vector.broadcast %cst_53 : f32 to vector<8x1xf32>
    %129 = arith.divf %127, %128 : vector<8x1xf32>
    %130 = vector.broadcast %129 : vector<8x1xf32> to vector<8x32xf32>
    %131 = arith.subf %125, %130 : vector<8x32xf32>
    %132 = arith.mulf %131, %131 : vector<8x32xf32>
    %cst_54 = arith.constant dense<0.000000e+00> : vector<8xf32>
    %133 = vector.multi_reduction <add>, %132, %cst_54 [1] : vector<8x32xf32> to vector<8xf32>
    %134 = vector.shape_cast %133 : vector<8xf32> to vector<8x1xf32>
    %cst_55 = arith.constant 3.200000e+01 : f32
    %135 = vector.broadcast %cst_55 : f32 to vector<8x1xf32>
    %136 = arith.divf %134, %135 : vector<8x1xf32>
    %137 = vector.broadcast %129 : vector<8x1xf32> to vector<8x32xf32>
    %138 = arith.subf %125, %137 : vector<8x32xf32>
    %cst_56 = arith.constant 9.99999974E-6 : f32
    %139 = vector.broadcast %cst_56 : f32 to vector<8x1xf32>
    %140 = arith.addf %136, %139 : vector<8x1xf32>
    %141 = math.rsqrt %140 : vector<8x1xf32>
    %142 = vector.broadcast %141 : vector<8x1xf32> to vector<8x32xf32>
    %143 = arith.mulf %138, %142 : vector<8x32xf32>
    %c7 = arith.constant 7 : index
    %c0_57 = arith.constant 0 : index
    %144 = vector.load %arg8[%c7, %c0_57] : memref<9x32xf32, #tpu.memory_space<vmem>>, vector<1x32xf32>
    %145 = vector.shape_cast %144 : vector<1x32xf32> to vector<32xf32>
    %146 = vector.shape_cast %145 : vector<32xf32> to vector<1x32xf32>
    %147 = vector.broadcast %146 : vector<1x32xf32> to vector<8x32xf32>
    %148 = arith.mulf %143, %147 : vector<8x32xf32>
    %c8 = arith.constant 8 : index
    %c0_58 = arith.constant 0 : index
    %149 = vector.load %arg8[%c8, %c0_58] : memref<9x32xf32, #tpu.memory_space<vmem>>, vector<1x32xf32>
    %150 = vector.shape_cast %149 : vector<1x32xf32> to vector<32xf32>
    %151 = vector.shape_cast %150 : vector<32xf32> to vector<1x32xf32>
    %152 = vector.broadcast %151 : vector<1x32xf32> to vector<8x32xf32>
    %153 = arith.addf %148, %152 : vector<8x32xf32>
    %c0_59 = arith.constant 0 : index
    %c0_60 = arith.constant 0 : index
    %c0_61 = arith.constant 0 : index
    %154 = vector.load %arg10[%c0_59, %c0_60, %c0_61] : memref<1x8x32xf32, #tpu.memory_space<vmem>>, vector<1x8x32xf32>
    %155 = vector.shape_cast %154 : vector<1x8x32xf32> to vector<8x32xf32>
    %156 = vector.shape_cast %153 : vector<8x32xf32> to vector<1x8x32xf32>
    tpu.vector_store %arg10[%c0_59, %c0_60, %c0_61], %156 {strides = array<i32>} : memref<1x8x32xf32, #tpu.memory_space<vmem>>, vector<1x8x32xf32>,
    return
  }
  func.func @transform_0(%arg0: i32, %arg1: i32) -> (i32, i32, i32) {
    %c0_i32 = arith.constant 0 : i32
    %c0_i32_0 = arith.constant 0 : i32
    %c0_i32_1 = arith.constant 0 : i32
    return %arg0, %c0_i32, %c0_i32_0 : i32, i32, i32
  }
  func.func @transform_1(%arg0: i32, %arg1: i32) -> (i32, i32) {
    %c0_i32 = arith.constant 0 : i32
    %c0_i32_0 = arith.constant 0 : i32
    %c0_i32_1 = arith.constant 0 : i32
    return %c0_i32, %c0_i32_0 : i32, i32
  }
  func.func @transform_2(%arg0: i32, %arg1: i32) -> (i32, i32) {
    %c0_i32 = arith.constant 0 : i32
    %c0_i32_0 = arith.constant 0 : i32
    %c0_i32_1 = arith.constant 0 : i32
    return %c0_i32, %c0_i32_0 : i32, i32
  }
  func.func @transform_3(%arg0: i32, %arg1: i32) -> (i32, i32) {
    %c0_i32 = arith.constant 0 : i32
    %c0_i32_0 = arith.constant 0 : i32
    %c0_i32_1 = arith.constant 0 : i32
    return %c0_i32, %c0_i32_0 : i32, i32
  }
  func.func @transform_4(%arg0: i32, %arg1: i32) -> (i32, i32) {
    %c0_i32 = arith.constant 0 : i32
    %c0_i32_0 = arith.constant 0 : i32
    %c0_i32_1 = arith.constant 0 : i32
    return %c0_i32, %c0_i32_0 : i32, i32
  }
  func.func @transform_5(%arg0: i32, %arg1: i32) -> (i32, i32) {
    %c0_i32 = arith.constant 0 : i32
    %c0_i32_0 = arith.constant 0 : i32
    %c0_i32_1 = arith.constant 0 : i32
    return %c0_i32, %c0_i32_0 : i32, i32
  }
  func.func @transform_6(%arg0: i32, %arg1: i32) -> (i32, i32) {
    %c0_i32 = arith.constant 0 : i32
    %c0_i32_0 = arith.constant 0 : i32
    %c0_i32_1 = arith.constant 0 : i32
    return %c0_i32, %c0_i32_0 : i32, i32
  }
  func.func @transform_7(%arg0: i32, %arg1: i32) -> (i32, i32) {
    %c0_i32 = arith.constant 0 : i32
    %c0_i32_0 = arith.constant 0 : i32
    %c0_i32_1 = arith.constant 0 : i32
    return %c0_i32, %c0_i32_0 : i32, i32
  }
  func.func @transform_8(%arg0: i32, %arg1: i32) -> (i32, i32, i32) {
    %c0_i32 = arith.constant 0 : i32
    %c0_i32_0 = arith.constant 0 : i32
    return %arg0, %arg1, %c0_i32 : i32, i32, i32
  }
}

</mosaic_0001>

<bundles_post_ra>
// kernel: encoder_block_pallas.1
= control target key start
LH: loop header
LB: loop body
LE: loop exit
PB: predicated region body
PF: predicated region fallthrough
CT: control target
= control target key end

     0   :  { %s2034_s0 = inlined_call_operand.vmem [shape: f32[2,8,32], index: 0, kind: input, shape index: {}]   ;;  %s2035_s1 = inlined_call_operand.vmem [shape: bf16[32,32], index: 1, kind: input, shape index: {}]   ;;  %s2036_s2 = inlined_call_operand.vmem [shape: bf16[32,64], index: 2, kind: input, shape index: {}]   ;;  %s2037_s3 = inlined_call_operand.vmem [shape: bf16[32,32], index: 3, kind: input, shape index: {}]   ;;  %s2038_s4 = inlined_call_operand.vmem [shape: bf16[32,64], index: 4, kind: input, shape index: {}]   ;;  %s2039_s5 = inlined_call_operand.vmem [shape: bf16[64,32], index: 5, kind: input, shape index: {}]   ;;  %s2040_s6 = inlined_call_operand.vmem [shape: f32[9,32], index: 6, kind: input, shape index: {}]   ;;  %s2041_s7 = inlined_call_operand.vmem [shape: f32[1,64], index: 7, kind: input, shape index: {}]   ;;  %s2042_s8 = inlined_call_operand.hbm [shape: f32[2,8,32], index: 8, kind: output, shape index: {}]  }
   0x1   :  { %2043 = sst [smem:[#allocation8_spill]] %s2034_s0 }
   0x2   :  { %13 = vsyncpa [#allocation6], 0 }
   0x3   :  { %15 = vsyncpa [#allocation6 + $0x1], 0  ;;  %s1772_s27 = smov 0   ;;  %s1774_s28 = smov 0  }
   0x4   :  { %s1776_s29 = smov 0   ;;  %s1778_s30 = smov 0  }
   0x5   :  { %s1780_s9 = smov 0   ;;  %s1782_s10 = smov 0  }
   0x6 LB: > { %s1356_s11 = sadd.s32 4294967295, %s1711_s10   ;;  %s1357_s12 = sadd.s32 4294967294, %s1711_s10   ;;  %s1711_s10 = sphi %s1782_s10, %s21_s10   ;;  %s1707_s9 = sphi %s1780_s9, %s2051_s9   ;;  %s1703_s30 = sphi %s1778_s30, %s2050_s30   ;;  %s1699_s29 = sphi %s1776_s29, %s2049_s29   ;;  %s1695_s28 = sphi %s1774_s28, %s2048_s28   ;;  %s1691_s27 = sphi %s1772_s27, %s2047_s27  }
   0x7   : > { %s33_s13 = sadd.s32 1, %s1707_s9  ;;  %s215_s14 = sadd.s32 1, %s1699_s29 }
   0x8   : > { %p35_p0 = scmp.ge.s32.totalorder %s33_s13, 2  ;;  %p225_p1 = scmp.ne.s32.totalorder %s1699_s29, %s1695_s28 }
   0x9   : > { %p226_p2 = scmp.eq.s32.totalorder %s1356_s11, 1  ;;  %p231_p3 = scmp.ne.s32.totalorder %s1695_s28, %s1691_s27 }
   0xa   : > { %s2053_s13 = smov (%p35_p0, %s33_s13), 0  ;;  %p232_p5 = scmp.eq.s32.totalorder %s1357_s12, 1 }
   0xb   : > { %p1812_p4 = por %p226_p2, %p225_p1  ;;  %s210_s16 = ssub.s32 %s1707_s9, %s2053_s13 }
   0xc   : > { %p1360_p6 = scmp.ge.s32.totalorder %s1711_s10, 1  ;;  %p213_p7 = scmp.eq.s32.totalorder %s210_s16, 0 }
   0xd   : > { %p1819_p8 = por %p232_p5, %p231_p3  ;;  %p278_p9 = scmp.lt.s32.totalorder %s1711_s10, 3 }
   0xe   : > { %s1825_s18 = scalar_select %p213_p7, %s1699_s29, %s215_s14  }
   0xf   : > { %p279_p10 = pnand %p1360_p6, %p278_p9 }
  0x10   : > { %p311_p11 = scmp.lt.s32.totalorder (!%p279_p10), %s1703_s30, 1  ;;  %s2046_s0 = sld [smem:[#allocation8_spill]] (!%p279_p10) }
  0x11   : > { %282 = sbr.rel (%p279_p10) target bundleno = 2276 (0x8e4), region = 52  ;;  %s1715_s22 = smov (!%p279_p10), 104  }
  0x12   : > { %s1717_s26 = smov (!%p279_p10), 112   ;;  %s1719_s16 = smov (!%p279_p10), 96  }
  0x13   : > { %s1720_s19 = smov (!%p279_p10), 88   ;;  %s1721_s20 = smov (!%p279_p10), 80  }
  0x14   : > { %s1722_s21 = smov (!%p279_p10), 72   ;;  %s1724_s11 = smov (!%p279_p10), 16  }
  0x15   : > { %s1725_s12 = smov (!%p279_p10), 24  }
  0x16   : > { %v1601_v0 = vld [vmem:[%s2036_s2 + $0x8] sm:$0xff]   ;;  %v1713_v1 = vmov 0.0   ;;  %v1602_v2 = vld [vmem:[%s2036_s2] sm:$0xff]   ;;  %vm1714_vm0 = vmmov 0   ;;  %s312_s23 = scalar_select %p311_p11, %s1703_s30, 1  ;;  %vm338_vm1 = vcmask 261120  }
  0x17   : > { %1441 = vmatprep.subr.bf16.mxu1 %v1713_v1  ;;  %1457 = vmatprep.subr.bf16.mxu0 %v1713_v1  ;;  %v1603_v3 = vld [vmem:[%s2035_s1 + $0x8] sm:$0xff]   ;;  %v1604_v6 = vld [vmem:[%s2035_s1] sm:$0xff]   ;;  %vm399_vm2 = vcmask 60416   ;;  %vm540_vm3 = vcmask 64512   ;;  %vm788_vm4 = vcmask 1043456   ;;  %vm994_vm5 = vcmask 130048  }
  0x18   : > { %1442 = vmatpush3.bf16.msra.mxu1 %v1601_v0  ;;  %1445 = vmatprep.mubr.msk.bf16.mxu1 %vm1714_vm0, %v1713_v1  ;;  %s1362_s24 = sshll.u32 %s312_s23, 3  ;;  %v1366_v7 = vld [vmem:[%s2040_s6 + $0x1] ss:$0 sm:$0xff]  ;;  %s1716_s23 = smov 120   ;;  %v1370_v14 = vld [vmem:[%s2040_s6] ss:$0 sm:$0xff] }
  0x19   : > { %1443 = vmatprep.subr.bf16.mxu1 %v1713_v1  ;;  %1459 = vmatprep.mubr.msk.bf16.mxu0 %vm1714_vm0, %v1713_v1  ;;  %s314_s14 = scalar_lea.vmem %s2046_s0, %s1362_s24  ;;  %v1367_v23 = vld [vmem:[%s2040_s6 + $0x2] ss:$0 sm:$0xff]  ;;  %vm997_vm6 = vcmask 195584   ;;  %vm1200_vm7 = vcmask 523264  }
  0x1a   : > { %v1849_v4 = vld [vmem:[%s314_s14] sm:$0xff]  ;;  %s1718_s14 = smov 32  }
  0x1b   : > { %v321_v5 = vpack.c.bf16 %v1849_v4, %v1849_v4 }
  0x1c   : > { %1444 = vmatpush3.bf16.msra.mxu1 %v1602_v2 }
  0x1d   : > { %1449 = vmatprep.subr.bf16.mxu1 %v1713_v1 }
  0x1f   : > { %1446 = vmatmul.mubr.msk.bf16.vlgmr.msra.gmra.mxu1 %vm338_vm1, %v321_v5 }
  0x20   : > { %1450 = vmatpush3.bf16.msra.mxu1 %v1603_v3  ;;  %1453 = vmatprep.mubr.msk.bf16.mxu1 %vm1714_vm0, %v1713_v1 }
  0x21   : > { %1451 = vmatprep.subr.bf16.mxu1 %v1713_v1 }
  0x24   : > { %1452 = vmatpush3.bf16.msra.mxu1 %v1604_v6 }
  0x25   : > { %1463 = vmatprep.subr.bf16.mxu1 %v1713_v1 }
  0x27   : > { %1454 = vmatmul.mubr.msk.bf16.vlgmr.msra.gmra.mxu1 %vm338_vm1, %v321_v5 }
  0x28   : > { %1465 = vmatprep.mubr.msk.bf16.mxu1 %vm1714_vm0, %v1713_v1 }
  0xdf   : > { %v376_v8 = vpop.f32.mrf.mxu1 }
  0xe0   : > { %v387_v9 = vadd.f32 %v1366_v7, %v376_v8 }
  0xe1   : > { %v1447_v10 = vpop.f32.mrf.mxu1 }
  0xe2   : > { %v398_v11 = vpack.c.bf16 %v387_v9, %v387_v9 }
  0xe3   : > { %v379_v12 = vpop.f32.mrf.mxu1 }
  0xe4   : > { %400 = vst.msk [vmem:[#allocation3] sm:$0xf] %vm399_vm2, %v398_v11  ;;  %432 = vrot.lane.b32.xlu1 %v398_v11, %s1715_s22  ;;  %412 = vrot.lane.b32.xlu0 %v398_v11, %s1716_s23 }
  0xe5   : > { %v1448_v13 = vpop.f32.mrf.mxu1 }
  0xe7   : > { %v505_v15 = vpop.f32.mrf.mxu1 }
  0xe8   : > { %v506_v16 = vadd.f32 %v1370_v14, %v505_v15  ;;  %422 = vrot.lane.b32.xlu0 %v398_v11, %s1717_s26 }
  0xe9   : > { %v1455_v17 = vpop.f32.mrf.mxu1 }
  0xea   : > { %v511_v18 = vpack.c.bf16 %v506_v16, %v506_v16 }
  0xeb   : > { %v508_v19 = vpop.f32.mrf.mxu1  ;;  %v536_v20 = vld [vmem:[#allocation3] sm:$0xf] }
  0xec   : > { %513 = vst.msk [vmem:[#allocation2] sm:$0xf] %vm399_vm2, %v511_v18  ;;  %522 = vrot.lane.b32.xlu0 %v511_v18, %s1717_s26  ;;  %517 = vrot.lane.b32.xlu1 %v511_v18, %s1716_s23  ;;  %v545_v21 = vsel %vm540_vm3, %v536_v20, 0  ;;  %s1723_s26 = smov 8  }
  0xed   : > { %v1456_v22 = vpop.f32.mrf.mxu1  ;;  %1458 = vmatpush3.bf16.xpose.msra.mxu0 %v545_v21 }
  0xee   : > { %1469 = vmatprep.subr.bf16.mxu0 %v1713_v1 }
  0xf0   : > { %394 = vrot.lane.b32.xlu0 %v1367_v23, %s1718_s14  ;;  %527 = vrot.lane.b32.xlu1 %v511_v18, %s1715_s22 }
  0xf3   : > { %v532_v24 = vld [vmem:[#allocation2] sm:$0xf] }
  0xf4   : > { %1460 = vmatmul.mubr.msk.bf16.vlgmr.msra.gmra.mxu0 %vm540_vm3, %v532_v24 }
  0xf5   : > { %1471 = vmatprep.mubr.msk.bf16.mxu0 %vm1714_vm0, %v1713_v1 }
 0x156   : > { %v433_v25 = vpop.permute.xlu1 %432  ;;  %v413_v26 = vpop.permute.xlu0 %412 }
 0x157   : > { %436 = vst.msk [vmem:[#allocation3 + $0xc] sm:$0xf] %vm399_vm2, %v433_v25  ;;  %416 = vst.msk [vmem:[#allocation3 + $0x4] sm:$0xf] %vm399_vm2, %v413_v26 }
 0x15a   : > { %v423_v27 = vpop.permute.xlu0 %422 }
 0x15b   : > { %426 = vst.msk [vmem:[#allocation3 + $0x8] sm:$0xf] %vm399_vm2, %v423_v27 }
 0x15e   : > { %v523_v28 = vpop.permute.xlu0 %522  ;;  %v518_v29 = vpop.permute.xlu1 %517  ;;  %v537_v30 = vld [vmem:[#allocation3 + $0x4] sm:$0xf]  ;;  %v539_v38 = vld [vmem:[#allocation3 + $0xc] sm:$0xf] }
 0x15f   : > { %526 = vst.msk [vmem:[#allocation2 + $0x8] sm:$0xf] %vm399_vm2, %v523_v28  ;;  %521 = vst.msk [vmem:[#allocation2 + $0x4] sm:$0xf] %vm399_vm2, %v518_v29  ;;  %v591_v31 = vsel %vm540_vm3, %v537_v30, 0  ;;  %v683_v40 = vsel %vm540_vm3, %v539_v38, 0 }
 0x160   : > { %1464 = vmatpush3.bf16.xpose.msra.mxu1 %v591_v31 }
 0x161   : > { %1475 = vmatprep.subr.bf16.mxu1 %v1713_v1 }
 0x162   : > { %v395_v32 = vpop.permute.xlu0 %394  ;;  %v528_v33 = vpop.permute.xlu1 %527  ;;  %v538_v34 = vld [vmem:[#allocation3 + $0x8] sm:$0xf] }
 0x163   : > { %v397_v35 = vadd.f32 %v395_v32, %v376_v8  ;;  %531 = vst.msk [vmem:[#allocation2 + $0xc] sm:$0xf] %vm399_vm2, %v528_v33  ;;  %v637_v36 = vsel %vm540_vm3, %v538_v34, 0 }
 0x164   : > { %1470 = vmatpush3.bf16.xpose.msra.mxu0 %v637_v36 }
 0x165   : > { %v1405_v37 = vpack.c.bf16 %v397_v35, %v397_v35  ;;  %1481 = vmatprep.subr.bf16.mxu0 %v1713_v1 }
 0x166   : > { %v533_v39 = vld [vmem:[#allocation2 + $0x4] sm:$0xf]  ;;  %v534_v41 = vld [vmem:[#allocation2 + $0x8] sm:$0xf] }
 0x167   : > { %405 = vrot.lane.b32.xlu0 %v1405_v37, %s1719_s16  ;;  %417 = vrot.lane.b32.xlu1 %v1405_v37, %s1720_s19  ;;  %s1726_s16 = smov [#allocation5]  }
 0x168   : > { %1466 = vmatmul.mubr.msk.bf16.vlgmr.msra.gmra.mxu1 %vm540_vm3, %v533_v39  ;;  %s1639_s19 = sshll.u32 %s1726_s16, 4  ;;  %s1640_s19 = int_to_ptr.vmem [resolvable:$false] %s1639_s19 }
 0x169   : > { %1476 = vmatpush3.bf16.xpose.msra.mxu1 %v683_v40  ;;  %1477 = vmatprep.mubr.msk.bf16.mxu1 %vm1714_vm0, %v1713_v1 }
 0x16a   : > { %1487 = vmatprep.subr.bf16.mxu1 %v1713_v1  ;;  %v535_v42 = vld [vmem:[#allocation2 + $0xc] sm:$0xf] }
 0x16b   : > { %1472 = vmatmul.mubr.msk.bf16.vlgmr.msra.gmra.mxu0 %vm540_vm3, %v534_v41 }
 0x16c   : > { %1483 = vmatprep.mubr.msk.bf16.mxu0 %vm1714_vm0, %v1713_v1 }
 0x170   : > { %1478 = vmatmul.mubr.msk.bf16.vlgmr.msra.gmra.mxu1 %vm540_vm3, %v535_v42 }
 0x171   : > { %1489 = vmatprep.mubr.msk.bf16.mxu1 %vm1714_vm0, %v1713_v1 }
 0x1b4   : > { %v581_v43 = vpop.f32.mrf.mxu0 }
 0x1b5   : > { %v725_v44 = vsel %vm540_vm3, %v581_v43, -inf }
 0x1b6   : > { %726 = vmax.xlane.f32.xlu1 %v725_v44  ;;  %v1461_v45 = vpop.f32.mrf.mxu0 }
 0x1b8   : > { %v584_v46 = vpop.f32.mrf.mxu0 }
 0x1ba   : > { %v1462_v47 = vpop.f32.mrf.mxu0 }
 0x1d9   : > { %v406_v48 = vpop.permute.xlu0 %405  ;;  %v418_v49 = vpop.permute.xlu1 %417 }
 0x1da   : > { %408 = vst.msk [vmem:[#allocation4] sm:$0xf] %vm399_vm2, %v406_v48  ;;  %421 = vst.msk [vmem:[#allocation4 + $0x4] sm:$0xf] %vm399_vm2, %v418_v49 }
 0x1e1   : > { %v781_v50 = vld [vmem:[#allocation4] sm:$0xf]  ;;  %v782_v51 = vld [vmem:[#allocation4 + $0x4] sm:$0xf] }
 0x1e2   : > { %v790_v52 = vsel %vm788_vm4, %v781_v50, 0  ;;  %v836_v53 = vsel %vm788_vm4, %v782_v51, 0 }
 0x1e3   : > { %1482 = vmatpush3.bf16.msra.mxu0 %v790_v52  ;;  %1488 = vmatpush3.bf16.msra.mxu1 %v836_v53 }
 0x1e4   : > { %1493 = vmatprep.subr.bf16.mxu0 %v1713_v1  ;;  %1499 = vmatprep.subr.bf16.mxu1 %v1713_v1 }
 0x228   : > { %v627_v54 = vpop.f32.mrf.mxu1 }
 0x229   : > { %v728_v55 = vsel %vm540_vm3, %v627_v54, -inf }
 0x22a   : > { %729 = vmax.xlane.f32.xlu0 %v728_v55  ;;  %v1467_v56 = vpop.f32.mrf.mxu1  ;;  %v1606_v55 = vld [vmem:[%s2037_s3] sm:$0xff]  }
 0x22b   : > { %v673_v57 = vpop.f32.mrf.mxu0 }
 0x22c   : > { %v630_v58 = vpop.f32.mrf.mxu1  ;;  %v731_v59 = vsel %vm540_vm3, %v673_v57, -inf }
 0x22d   : > { %v1473_v60 = vpop.f32.mrf.mxu0 }
 0x22e   : > { %732 = vmax.xlane.f32.xlu0 %v731_v59  ;;  %v1468_v61 = vpop.f32.mrf.mxu1 }
 0x22f   : > { %v676_v62 = vpop.f32.mrf.mxu0 }
 0x230   : > { %v719_v63 = vpop.f32.mrf.mxu1 }
 0x231   : > { %v1474_v0 = vpop.f32.mrf.mxu0  ;;  %v734_v2 = vsel %vm540_vm3, %v719_v63, -inf }
 0x232   : > { %735 = vmax.xlane.f32.xlu1 %v734_v2  ;;  %v1479_v3 = vpop.f32.mrf.mxu1 }
 0x234   : > { %v722_v5 = vpop.f32.mrf.mxu1 }
 0x236   : > { %v1480_v6 = vpop.f32.mrf.mxu1 }
 0x23f   : > { %v727_v7 = vpop.xlane.xlu1 %726 }
 0x240   : > { %v737_v8 = vsub.f32 %v581_v43, %v727_v7 }
 0x242   : > { %v741_v9 = vpack.c.bf16 %v737_v8, %v737_v8 }
 0x243   : > { %427 = vrot.lane.b32.xlu1 %v1405_v37, %s1721_s20 }
 0x244   : > { %v746_v10 = vmul.bf16 1069105081, %v741_v9  ;;  %437 = vrot.lane.b32.xlu0 %v1405_v37, %s1722_s21  ;;  %s1402_s21 = sshll.u32 %s1703_s30, 7  ;;  %s1641_s30 = scalar_lea.vmem %s1640_s19, 256 }
 0x246   : > { %1613 = vpow.bf16 %v746_v10 }
 0x254   : > { %v1614_v11 = vpop.eup %1613 }
 0x255   : > { %1484 = vmatmul.mubr.msk.bf16.vlgmr.msra.gmra.mxu0 %vm540_vm3, %v1614_v11  ;;  %v757_v33 = vunpack.c.l.bf16 %v1614_v11 }
 0x256   : > { %1495 = vmatprep.mubr.msk.bf16.mxu0 %vm1714_vm0, %v1713_v1 }
 0x257   : > { %v761_v37 = vsel %vm540_vm3, %v757_v33, 0.0 }
 0x2b3   : > { %v730_v12 = vpop.xlane.xlu0 %729 }
 0x2b4   : > { %v738_v13 = vsub.f32 %v627_v54, %v730_v12  ;;  %v1605_v54 = vld [vmem:[%s2037_s3 + $0x8] sm:$0xff]  }
 0x2b6   : > { %v742_v14 = vpack.c.bf16 %v738_v13, %v738_v13 }
 0x2b7   : > { %v733_v15 = vpop.xlane.xlu0 %732 }
 0x2b8   : > { %v749_v16 = vmul.bf16 1069105081, %v742_v14  ;;  %v739_v17 = vsub.f32 %v673_v57, %v733_v15 }
 0x2ba   : > { %1615 = vpow.bf16 %v749_v16  ;;  %v743_v18 = vpack.c.bf16 %v739_v17, %v739_v17 }
 0x2bb   : > { %v438_v19 = vpop.permute.xlu0 %437  ;;  %v736_v20 = vpop.xlane.xlu1 %735 }
 0x2bc   : > { %v752_v21 = vmul.bf16 1069105081, %v743_v18  ;;  %441 = vst.msk [vmem:[#allocation4 + $0xc] sm:$0xf] %vm399_vm2, %v438_v19  ;;  %v740_v22 = vsub.f32 %v719_v63, %v736_v20 }
 0x2be   : > { %1617 = vpow.bf16 %v752_v21  ;;  %v744_v23 = vpack.c.bf16 %v740_v22, %v740_v22 }
 0x2bf   : > { %v428_v24 = vpop.permute.xlu1 %427 }
 0x2c0   : > { %v755_v25 = vmul.bf16 1069105081, %v744_v23  ;;  %431 = vst.msk [vmem:[#allocation4 + $0x8] sm:$0xf] %vm399_vm2, %v428_v24 }
 0x2c2   : > { %1619 = vpow.bf16 %v755_v25 }
 0x2c3   : > { %v784_v26 = vld [vmem:[#allocation4 + $0xc] sm:$0xf] }
 0x2c4   : > { %v928_v30 = vsel %vm788_vm4, %v784_v26, 0 }
 0x2c7   : > { %v783_v27 = vld [vmem:[#allocation4 + $0x8] sm:$0xf] }
 0x2c8   : > { %v1616_v28 = vpop.eup %1615  ;;  %v882_v29 = vsel %vm788_vm4, %v783_v27, 0  ;;  %v1383_v27 = vld [vmem:[%s2040_s6 + $0x3] ss:$0 sm:$0xff] }
 0x2c9   : > { %1490 = vmatmul.mubr.msk.bf16.vlgmr.msra.gmra.mxu1 %vm540_vm3, %v1616_v28  ;;  %1494 = vmatpush3.bf16.msra.mxu0 %v882_v29  ;;  %v758_v31 = vunpack.c.l.bf16 %v1616_v28 }
 0x2ca   : > { %1500 = vmatpush3.bf16.msra.mxu1 %v928_v30  ;;  %1501 = vmatprep.mubr.msk.bf16.mxu1 %vm1714_vm0, %v1713_v1 }
 0x2cb   : > { %v764_v32 = vsel %vm540_vm3, %v758_v31, 0.0  ;;  %1505 = vmatprep.subr.bf16.mxu0 %v1713_v1  ;;  %1513 = vmatprep.subr.bf16.mxu1 %v1713_v1 }
 0x2cc   : > { %v1618_v34 = vpop.eup %1617  ;;  %765 = vadd.xlane.f32.xlu1 %v764_v32 }
 0x2cd   : > { %1496 = vmatmul.mubr.msk.bf16.vlgmr.msra.gmra.mxu0 %vm540_vm3, %v1618_v34  ;;  %v759_v35 = vunpack.c.l.bf16 %v1618_v34 }
 0x2ce   : > { %1509 = vmatprep.mubr.msk.bf16.mxu0 %vm1714_vm0, %v1713_v1  ;;  %1506 = vmatpush3.bf16.msra.mxu0 %v1605_v54  ;;  %v1612_v54 = vld [vmem:[%s2039_s5] sm:$0xff]  }
 0x2cf   : > { %v767_v36 = vsel %vm540_vm3, %v759_v35, 0.0  ;;  %1507 = vmatprep.subr.bf16.mxu0 %v1713_v1 }
 0x2d0   : > { %v1620_v38 = vpop.eup %1619  ;;  %768 = vadd.xlane.f32.xlu0 %v767_v36  ;;  %762 = vadd.xlane.f32.xlu1 %v761_v37 }
 0x2d1   : > { %1502 = vmatmul.mubr.msk.bf16.vlgmr.msra.gmra.mxu1 %vm540_vm3, %v1620_v38  ;;  %v760_v39 = vunpack.c.l.bf16 %v1620_v38 }
 0x2d2   : > { %1517 = vmatprep.mubr.msk.bf16.mxu1 %vm1714_vm0, %v1713_v1  ;;  %1508 = vmatpush3.bf16.msra.mxu0 %v1606_v55  ;;  %v1389_v55 = vld [vmem:[%s2041_s7] ss:$0 sm:$0xff] }
 0x2d3   : > { %v770_v40 = vsel %vm540_vm3, %v760_v39, 0.0  ;;  %1521 = vmatprep.subr.bf16.mxu0 %v1713_v1 }
 0x2d4   : > { %771 = vadd.xlane.f32.xlu0 %v770_v40  ;;  %v1607_v40 = vld [vmem:[%s2038_s4 + $0x8] sm:$0xff]  }
 0x2d5   : > { %1514 = vmatpush3.bf16.msra.mxu1 %v1607_v40 }
 0x2d6   : > { %1515 = vmatprep.subr.bf16.mxu1 %v1713_v1 }
 0x315   : > { %v826_v41 = vpop.f32.mrf.mxu0 }
 0x317   : > { %v1485_v42 = vpop.f32.mrf.mxu0 }
 0x319   : > { %v829_v43 = vpop.f32.mrf.mxu0 }
 0x31b   : > { %v1486_v44 = vpop.f32.mrf.mxu0 }
 0x355   : > { %v766_v45 = vpop.xlane.xlu1 %765 }
 0x356   : > { %v774_v47 = vpack.c.bf16 %v766_v45, %v766_v45  ;;  %v1387_v45 = vld [vmem:[%s2040_s6 + $0x4] ss:$0 sm:$0xff] }
 0x358   : > { %v778_v48 = vunpack.c.l.bf16 %v774_v47  ;;  %v1388_v47 = vld [vmem:[%s2040_s6 + $0x5] ss:$0 sm:$0xff] }
 0x359   : > { %v769_v46 = vpop.xlane.xlu0 %768  ;;  %v763_v15 = vpop.xlane.xlu1 %762 }
 0x35a   : > { %v775_v49 = vpack.c.bf16 %v769_v46, %v769_v46  ;;  %1621 = vrcp.f32 %v778_v48  ;;  %v773_v16 = vpack.c.bf16 %v763_v15, %v763_v15 }
 0x35c   : > { %v779_v51 = vunpack.c.l.bf16 %v775_v49  ;;  %v777_v17 = vunpack.c.l.bf16 %v773_v16 }
 0x35d   : > { %v772_v50 = vpop.xlane.xlu0 %771 }
 0x35e   : > { %v776_v52 = vpack.c.bf16 %v772_v50, %v772_v50  ;;  %1623 = vrcp.f32 %v779_v51  ;;  %v1609_v51 = vld [vmem:[%s2039_s5 + $0x18] sm:$0xff]  }
 0x360   : > { %v780_v53 = vunpack.c.l.bf16 %v776_v52  ;;  %v1610_v52 = vld [vmem:[%s2039_s5 + $0x10] sm:$0xff]  }
 0x362   : > { %1625 = vrcp.f32 %v780_v53  ;;  %v1611_v53 = vld [vmem:[%s2039_s5 + $0x8] sm:$0xff]  }
 0x363   : > { %1627 = vrcp.f32 %v777_v17 }
 0x367   : > { %v1622_v56 = vpop.eup %1621 }
 0x36b   : > { %v1624_v61 = vpop.eup %1623 }
 0x36f   : > { %v1626_v6 = vpop.eup %1625 }
 0x370   : > { %v1628_v18 = vpop.eup %1627 }
 0x371   : > { %v974_v19 = vmul.f32 %v1628_v18, %v826_v41 }
 0x373   : > { %v978_v22 = vpack.c.bf16 %v974_v19, %v974_v19 }
 0x389   : > { %v872_v57 = vpop.f32.mrf.mxu1 }
 0x38a   : > { %v975_v58 = vmul.f32 %v1622_v56, %v872_v57 }
 0x38b   : > { %v1491_v59 = vpop.f32.mrf.mxu1 }
 0x38c   : > { %v979_v60 = vpack.c.bf16 %v975_v58, %v975_v58 }
 0x38d   : > { %v875_v62 = vpop.f32.mrf.mxu1  ;;  %v918_v63 = vpop.f32.mrf.mxu0 }
 0x38e   : > { %v976_v0 = vmul.f32 %v1624_v61, %v918_v63  ;;  %983 = vrot.lane.b32.xlu0 %v979_v60, %s1723_s26  ;;  %s1284_s26 = scalar_lea.hbm %s2042_s8, %s1402_s21 }
 0x38f   : > { %v1492_v2 = vpop.f32.mrf.mxu1  ;;  %v1497_v3 = vpop.f32.mrf.mxu0 }
 0x390   : > { %v980_v5 = vpack.c.bf16 %v976_v0, %v976_v0  ;;  %v1393_v3 = vld [vmem:[%s2040_s6 + $0x6] ss:$0 sm:$0xff] }
 0x391   : > { %v921_v7 = vpop.f32.mrf.mxu0  ;;  %v964_v8 = vpop.f32.mrf.mxu1 }
 0x392   : > { %v977_v9 = vmul.f32 %v1626_v6, %v964_v8  ;;  %986 = vrot.lane.b32.xlu1 %v980_v5, %s1724_s11  ;;  %s308_s11 = sand.u32 1, %s1695_s28  }
 0x393   : > { %v1498_v10 = vpop.f32.mrf.mxu0  ;;  %v1503_v11 = vpop.f32.mrf.mxu1  ;;  %s1272_s0 = scalar_lea.sflag [#allocation6], %s308_s11 }
 0x394   : > { %v981_v12 = vpack.c.bf16 %v977_v9, %v977_v9 }
 0x395   : > { %v967_v13 = vpop.f32.mrf.mxu1 }
 0x396   : > { %989 = vrot.lane.b32.xlu1 %v981_v12, %s1725_s12  ;;  %s1361_s12 = sshll.u32 %s308_s11, 3 }
 0x397   : > { %v1504_v14 = vpop.f32.mrf.mxu1  ;;  %s310_s22 = scalar_lea.vmem [#allocation5], %s1361_s12 }
 0x398   : > { %s1286_s23 = sshll.u32 %s310_s22, 4  ;;  %s1287_s23 = int_to_ptr.vmem [resolvable:$true] %s1286_s23 }
 0x399   : > { %s1635_s14 = scalar_lea.vmem %s1287_s23, 128  ;;  %p1642_p1 = scmp.lt.s32.totalorder %s1287_s23, %s1640_s19 }
 0x39a   : > { %p1636_p12 = scmp.ne.s32.totalorder %s1287_s23, %s1635_s14  ;;  %p1643_p2 = scmp.lt.s32.totalorder %s1641_s30, %s1635_s14 }
 0x39c   : > { %p1637_p13 = pnand %p1636_p12, %p1812_p4  ;;  %p1644_p3 = por %p1643_p2, %p1642_p1 }
 0x39e   : > { %p1638_p0 = pneg %p1637_p13 }
 0x3a0   : > { %p1645_p5 = pnand %p1644_p3, %p1638_p0 }
 0x400   : > { %v984_v20 = vpop.permute.xlu0 %983 }
 0x401   : > { %v993_v23 = vsel %vm540_vm3, %v978_v22, %v984_v20 }
 0x404   : > { %v987_v21 = vpop.permute.xlu1 %986 }
 0x405   : > { %v996_v24 = vsel %vm994_vm5, %v993_v23, %v987_v21  ;;  %v1399_v21 = vld [vmem:[%s2040_s6 + $0x7] ss:$0 sm:$0xff]  ;;  %v1400_v23 = vld [vmem:[%s2040_s6 + $0x8] ss:$0 sm:$0xff] }
 0x408   : > { %v990_v25 = vpop.permute.xlu1 %989 }
 0x409   : > { %v999_v26 = vsel %vm997_vm6, %v996_v24, %v990_v25 }
 0x40a   : > { %1510 = vmatmul.mubr.msk.bf16.vlgmr.msra.gmra.mxu0 %vm338_vm1, %v999_v26 }
 0x40b   : > { %1529 = vmatprep.mubr.msk.bf16.mxu0 %vm1714_vm0, %v1713_v1  ;;  %1522 = vmatpush3.bf16.msra.mxu0 %v1609_v51 }
 0x40c   : > { %1523 = vmatprep.subr.bf16.mxu0 %v1713_v1 }
 0x40f   : > { %1524 = vmatpush3.bf16.msra.mxu0 %v1610_v52 }
 0x410   : > { %1525 = vmatprep.subr.bf16.mxu0 %v1713_v1 }
 0x413   : > { %1526 = vmatpush3.bf16.msra.mxu0 %v1611_v53 }
 0x414   : > { %1527 = vmatprep.subr.bf16.mxu0 %v1713_v1 }
 0x417   : > { %1528 = vmatpush3.bf16.msra.mxu0 %v1612_v54 }
 0x4ca   : > { %v1057_v28 = vpop.f32.mrf.mxu0 }
 0x4cb   : > { %v1058_v29 = vadd.f32 %v1383_v27, %v1057_v28 }
 0x4cc   : > { %v1511_v30 = vpop.f32.mrf.mxu0 }
 0x4cd   : > { %v1063_v31 = vadd.f32 %v1058_v29, %v1849_v4  ;;  %v1608_v4 = vld [vmem:[%s2038_s4] sm:$0xff]  }
 0x4ce   : > { %v1060_v32 = vpop.f32.mrf.mxu0  ;;  %1516 = vmatpush3.bf16.msra.mxu1 %v1608_v4 }
 0x4cf   : > { %v1064_v33 = vsel %vm338_vm1, %v1063_v31, 0.0 }
 0x4d0   : > { %1065 = vadd.xlane.f32.xlu0 %v1064_v33  ;;  %v1512_v34 = vpop.f32.mrf.mxu0 }
 0x559   : > { %v1066_v35 = vpop.xlane.xlu0 %1065 }
 0x55a   : > { %v1068_v36 = vmul.f32 0.03125, %v1066_v35 }
 0x55c   : > { %v1069_v37 = vsub.f32 %v1063_v31, %v1068_v36 }
 0x55e   : > { %v1070_v38 = vmul.f32 %v1069_v37, %v1069_v37 }
 0x560   : > { %v1071_v39 = vsel %vm338_vm1, %v1070_v38, 0.0 }
 0x561   : > { %1072 = vadd.xlane.f32.xlu1 %v1071_v39 }
 0x5ea   : > { %v1073_v41 = vpop.xlane.xlu1 %1072 }
 0x5eb   : > { %v1074_v42 = vmul.f32 0.03125, %v1073_v41 }
 0x5ed   : > { %v1075_v43 = vadd.f32 1e-05, %v1074_v42 }
 0x5ef   : > { %1629 = vrsqrt.f32 %v1075_v43 }
 0x5fc   : > { %v1630_v44 = vpop.eup %1629 }
 0x5fd   : > { %v1077_v46 = vmul.f32 %v1630_v44, %v1069_v37 }
 0x5ff   : > { %v1083_v48 = vmul.f32 %v1387_v45, %v1077_v46 }
 0x601   : > { %v1089_v49 = vadd.f32 %v1388_v47, %v1083_v48 }
 0x603   : > { %v1090_v50 = vpack.c.bf16 %v1089_v49, %v1089_v49 }
 0x605   : > { %1518 = vmatmul.mubr.msk.bf16.vlgmr.msra.gmra.mxu1 %vm338_vm1, %v1090_v50 }
 0x6c5   : > { %v1151_v56 = vpop.f32.mrf.mxu1 }
 0x6c6   : > { %v1152_v57 = vadd.f32 %v1389_v55, %v1151_v56 }
 0x6c7   : > { %v1519_v58 = vpop.f32.mrf.mxu1 }
 0x6c8   : > { %v1158_v59 = vmul.f32 0.70710677, %v1152_v57  ;;  %v1157_v63 = vmul.f32 0.5, %v1152_v57 }
 0x6c9   : > { %v1154_v60 = vpop.f32.mrf.mxu1 }
 0x6ca   : > { %1631 = verf.f32 %v1158_v59 }
 0x6cb   : > { %v1520_v61 = vpop.f32.mrf.mxu1 }
 0x6d7   : > { %v1632_v62 = vpop.eup %1631 }
 0x6d8   : > { %v1160_v0 = vadd.f32 1.0, %v1632_v62 }
 0x6da   : > { %v1161_v1 = vmul.f32 %v1160_v0, %v1157_v63 }
 0x6dc   : > { %v1162_v2 = vpack.c.bf16 %v1161_v1, %v1161_v1 }
 0x6de   : > { %1530 = vmatmul.mubr.msk.bf16.vlgmr.msra.gmra.mxu0 %vm1200_vm7, %v1162_v2 }
 0x79e   : > { %v1238_v5 = vpop.f32.mrf.mxu0 }
 0x79f   : > { %v1239_v6 = vadd.f32 %v1393_v3, %v1238_v5 }
 0x7a0   : > { %v1531_v7 = vpop.f32.mrf.mxu0 }
 0x7a1   : > { %v1244_v8 = vadd.f32 %v1239_v6, %v1089_v49 }
 0x7a2   : > { %v1241_v9 = vpop.f32.mrf.mxu0 }
 0x7a3   : > { %v1245_v10 = vsel %vm338_vm1, %v1244_v8, 0.0 }
 0x7a4   : > { %1246 = vadd.xlane.f32.xlu0 %v1245_v10  ;;  %v1532_v11 = vpop.f32.mrf.mxu0 }
 0x82d   : > { %v1247_v12 = vpop.xlane.xlu0 %1246 }
 0x82e   : > { %v1248_v13 = vmul.f32 0.03125, %v1247_v12 }
 0x830   : > { %v1249_v14 = vsub.f32 %v1244_v8, %v1248_v13 }
 0x832   : > { %v1250_v15 = vmul.f32 %v1249_v14, %v1249_v14 }
 0x834   : > { %v1251_v16 = vsel %vm338_vm1, %v1250_v15, 0.0 }
 0x835   : > { %1252 = vadd.xlane.f32.xlu0 %v1251_v16 }
 0x8be   : > { %v1253_v17 = vpop.xlane.xlu0 %1252 }
 0x8bf   : > { %v1254_v18 = vmul.f32 0.03125, %v1253_v17 }
 0x8c1   : > { %v1255_v19 = vadd.f32 1e-05, %v1254_v18 }
 0x8c3   : > { %1633 = vrsqrt.f32 %v1255_v19 }
 0x8d0   : > { %v1634_v20 = vpop.eup %1633 }
 0x8d1   : > { %v1257_v22 = vmul.f32 %v1634_v20, %v1249_v14 }
 0x8d3   : > { %v1263_v24 = vmul.f32 %v1399_v21, %v1257_v22 }
 0x8d5   : > { %v1269_v25 = vadd.f32 %v1400_v23, %v1263_v24 }
 0x8d7   : > { %1270 = vst.msk [vmem:[%s310_s22] sm:$0xff] %vm338_vm1, %v1269_v25 }
 0x8d8   : > { %1648 = shalt.err (!%p1645_p5)
}
 0x8d9   : > { %s1649_s12 = scalar_lea.hbm %s1284_s26, 128  ;;  %s1653_s21 = scalar_lea.hbm %s2042_s8, 256 }
 0x8da   : > { %p1650_p6 = scmp.ne.s32.totalorder %s1284_s26, %s1649_s12  ;;  %p1654_p10 = scmp.lt.s32.totalorder %s1284_s26, %s2042_s8 }
 0x8db   : > { %p1655_p11 = scmp.lt.s32.totalorder %s1653_s21, %s1649_s12 }
 0x8dc   : > { %p1651_p7 = pnand %p1650_p6, %p1812_p4 }
 0x8dd   : > { %p1656_p12 = por %p1655_p11, %p1654_p10 }
 0x8de   : > { %p1652_p9 = pneg %p1651_p7 }
 0x8e0   : > { %p1657_p13 = pnand %p1656_p12, %p1652_p9 }
 0x8e2   : > { %1660 = shalt.err (!%p1657_p13)
}
 0x8e3   : > { %1533 = dma.vmem_to_hbm [thread:$0]  (%p1812_p4), %s1287_s23, 128, %s1284_s26, %s1272_s0  }
 0x8e4 PF: > { %p1539_p0 = scmp.ge.s32.totalorder %s1711_s10, 2  ;;  %s1298_s25 = sand.u32 1, %s1691_s27  }
 0x8e5   : > { %s1299_s14 = scalar_lea.sflag [#allocation6], %s1298_s25 }
 0x8e6   : > { %p1536_p1 = pnand %p1539_p0, %p1819_p8 }
 0x8e8   : > { %p1537_p2 = pneg %p1536_p1 }
 0x8ea   : > { %1686 = dma.done.wait (%p1537_p2), %s1299_s14, 128  }
 0x8eb   : > { %1688 = vsyncadd (%p1537_p2), %s1299_s14, 4294967168  ;;  %s21_s10 = sadd.s32 1, %s1711_s10   ;;  %s2047_s27 = smov %s1695_s28 }
 0x8ec   : > { %p18_p3 = scmp.ge.s32.totalorder %s21_s10, 4   ;;  %s2048_s28 = smov %s1699_s29 }
 0x8ed   : > { %s2049_s29 = smov %s1825_s18  ;;  %s2050_s30 = smov %s1707_s9 }
 0x8ee   : > { %s2051_s9 = smov %s2053_s13  ;;  %20 = sbr.rel (!%p18_p3) target bundleno = 6 (0x6), region = 101 }
 0x8f3   :  { %1304 = vsyncpa [#allocation6], 1 }
 0x8f4   :  { %1306 = vsyncpa [#allocation6 + $0x1], 1 }

</bundles_post_ra>
